<compile_context>
chip_gen: v7x
topology: tpu7x:2x2x1
jax: 0.10.0
libtpu: 0.0.40
codegen_flags: <defaults>
</compile_context>

<pallas_src>
import functools

import jax
import jax.numpy as jnp
from jax.experimental import pallas as pl
from jax.experimental.pallas import tpu as pltpu

HIDDEN1 = 64
HIDDEN2 = 64
HIDDEN3 = 64
LANE = 128            # output N padded to full lane width -> unmasked vst
MAX_TILE_B = 8192     # rows per grid step (multiple of 8); ~14 MiB peak footprint
_STEP_OVERHEAD_ROWS = 1024  # ~0.35 us/step expressed in "rows of HBM time"


def _mlp_kernel(x_ref, w1_ref, b1_ref, w2_ref, b2_ref, w3_ref, b3_ref,
                w4_ref, b4_ref, o_ref):
    # Cast x to bf16 in-kernel (free on the VPU; avoids an extra HBM pass).
    x = x_ref[...].astype(jnp.bfloat16)
    # Hidden layers: bf16 MXU matmul with f32 accumulation; bias + ReLU run in
    # the bias dtype (bf16 on v6e/v7x, f32 on v5e). Dropout == identity (eval).
    h = jnp.dot(x, w1_ref[...], preferred_element_type=jnp.float32)
    h = jnp.maximum(h.astype(b1_ref.dtype) + b1_ref[...], 0).astype(jnp.bfloat16)
    h = jnp.dot(h, w2_ref[...], preferred_element_type=jnp.float32)
    h = jnp.maximum(h.astype(b2_ref.dtype) + b2_ref[...], 0).astype(jnp.bfloat16)
    h = jnp.dot(h, w3_ref[...], preferred_element_type=jnp.float32)
    h = jnp.maximum(h.astype(b3_ref.dtype) + b3_ref[...], 0).astype(jnp.bfloat16)
    # Output layer (no activation): f32 bias add, lane-dense bf16 store.
    out = jnp.dot(h, w4_ref[...], preferred_element_type=jnp.float32)
    o_ref[...] = (out + b4_ref[...]).astype(o_ref.dtype)


def _pick_act_dtype():
    """bf16 bias/ReLU on chips with a native bf16 VPU (v6e/v7x); f32 otherwise."""
    try:
        kind = jax.devices()[0].device_kind.lower()
    except Exception:
        kind = ""
    if ("v6" in kind) or ("v7" in kind):
        return jnp.bfloat16
    return jnp.float32


def _choose_batch_tiling(B):
    """Pick (tile_b, b_pad): minimize padding waste + per-step overhead,
    prefer >=2 grid steps (v7x megacore), tile_b multiple of 8, <= MAX_TILE_B."""
    b8 = ((B + 7) // 8) * 8
    if b8 <= 8:
        return 8, 8
    n_min = max(2, -(-b8 // MAX_TILE_B))
    best = None
    for n in range(n_min, n_min + 64):
        tile = ((-(-b8 // n)) + 7) // 8 * 8
        if tile > MAX_TILE_B:
            continue
        pad = n * tile - B
        cost = pad + _STEP_OVERHEAD_ROWS * n
        if best is None or cost < best[0]:
            best = (cost, tile, n)
    _, tile, n = best
    return tile, n * tile


def prepare_params(params):
    """One-time weight prep (outside the hot path): torch (out,in) -> (in,out),
    bf16 matmul operands, layer-4 W/b zero-padded to 128 output lanes."""
    num_classes = params["w4"].shape[0]
    act_dtype = _pick_act_dtype()
    w4 = jnp.zeros((HIDDEN3, LANE), jnp.bfloat16).at[:, :num_classes].set(
        params["w4"].T.astype(jnp.bfloat16))
    b4 = jnp.zeros((1, LANE), jnp.float32).at[:, :num_classes].set(
        params["b4"].astype(jnp.float32))
    prepped = dict(
        w1=jnp.asarray(params["w1"].T, jnp.bfloat16),
        b1=jnp.asarray(params["b1"][None, :], act_dtype),
        w2=jnp.asarray(params["w2"].T, jnp.bfloat16),
        b2=jnp.asarray(params["b2"][None, :], act_dtype),
        w3=jnp.asarray(params["w3"].T, jnp.bfloat16),
        b3=jnp.asarray(params["b3"][None, :], act_dtype),
        w4=w4, b4=b4,
    )
    return prepped, num_classes


@functools.partial(jax.jit, static_argnums=2)
def mlp_forward(x, prepped, num_classes):
    """x: [B, input_size] float32. prepped: output of prepare_params. Returns bf16."""
    B, F = x.shape
    tile_b, b_pad = _choose_batch_tiling(B)
    if b_pad != B:
        x = jnp.pad(x, ((0, b_pad - B), (0, 0)))
    grid = (b_pad // tile_b,)

    def resident(shape):
        # Same block every grid step -> weights/biases stay VMEM-resident.
        return pl.BlockSpec(shape, lambda i: (0, 0))

    p = prepped
    flops = 2 * b_pad * (F * HIDDEN1 + HIDDEN1 * HIDDEN2 +
                         HIDDEN2 * HIDDEN3 + HIDDEN3 * LANE)
    bytes_accessed = (b_pad * F * x.dtype.itemsize + b_pad * LANE * 2 +
                      sum(int(v.size) * v.dtype.itemsize for v in p.values()))

    out_padded = pl.pallas_call(
        _mlp_kernel,
        out_shape=jax.ShapeDtypeStruct((b_pad, LANE), jnp.bfloat16),
        grid=grid,
        in_specs=[
            pl.BlockSpec((tile_b, F), lambda i: (i, 0)),   # x tiled over batch
            resident(p["w1"].shape), resident(p["b1"].shape),
            resident(p["w2"].shape), resident(p["b2"].shape),
            resident(p["w3"].shape), resident(p["b3"].shape),
            resident(p["w4"].shape), resident(p["b4"].shape),
        ],
        out_specs=pl.BlockSpec((tile_b, LANE), lambda i: (i, 0)),
        compiler_params=pltpu.CompilerParams(
            dimension_semantics=("parallel",),             # megacore on v7x
            vmem_limit_bytes=32 * 1024 * 1024),            # safe on 64 MiB v7x
        cost_estimate=pl.CostEstimate(
            flops=flops, transcendentals=0, bytes_accessed=bytes_accessed),
    )(x, p["w1"], p["b1"], p["w2"], p["b2"], p["w3"], p["b3"], p["w4"], p["b4"])

    # Strip batch padding and the lane padding of the output dim.
    return out_padded[:B, :num_classes]


def _init_linear(key, in_f, out_f):
    # Deterministic init matching torch.nn.Linear's uniform(-1/sqrt(in), 1/sqrt(in)).
    kw, kb = jax.random.split(key)
    bound = 1.0 / jnp.sqrt(jnp.float32(in_f))
    w = jax.random.uniform(kw, (out_f, in_f), jnp.float32, -bound, bound)
    b = jax.random.uniform(kb, (out_f,), jnp.float32, -bound, bound)
    return w, b


def _reference_forward(x, params):
    h = jnp.maximum(x @ params["w1"].T + params["b1"], 0.0)
    h = jnp.maximum(h @ params["w2"].T + params["b2"], 0.0)
    h = jnp.maximum(h @ params["w3"].T + params["b3"], 0.0)
    return h @ params["w4"].T + params["b4"]


if __name__ == "__main__":
    input_size = 32
    num_classes = 10
    batch = 8

    key = jax.random.PRNGKey(0)
    kx, k1, k2, k3, k4 = jax.random.split(key, 5)

    x = jax.random.normal(kx, (batch, input_size), jnp.float32)

    w1, b1 = _init_linear(k1, input_size, HIDDEN1)
    w2, b2 = _init_linear(k2, HIDDEN1, HIDDEN2)
    w3, b3 = _init_linear(k3, HIDDEN2, HIDDEN3)
    w4, b4 = _init_linear(k4, HIDDEN3, num_classes)
    params = dict(w1=w1, b1=b1, w2=w2, b2=b2, w3=w3, b3=b3, w4=w4, b4=b4)

    prepped, n_cls = prepare_params(params)   # one-time weight prep (off hot path)
    out = mlp_forward(x, prepped, n_cls)
    out = jax.block_until_ready(out)

    ref = _reference_forward(x, params)       # f32 reference; kernel is bf16 MXU/out
    assert out.shape == (batch, num_classes)
    assert jnp.allclose(out.astype(jnp.float32), ref, atol=5e-2, rtol=5e-2), \
        "mismatch vs reference"

    print("KERNEL_OK")
</pallas_src>

<mosaic_0001>
module attributes {stable_mosaic.version = 11 : i64} {
  func.func @_mlp_kernel(%arg0: i32, %arg1: memref<8x32xf32, #tpu.memory_space<vmem>>, %arg2: memref<32x64xbf16, #tpu.memory_space<vmem>>, %arg3: memref<1x64xf32, #tpu.memory_space<vmem>>, %arg4: memref<64x64xbf16, #tpu.memory_space<vmem>>, %arg5: memref<1x64xf32, #tpu.memory_space<vmem>>, %arg6: memref<64x64xbf16, #tpu.memory_space<vmem>>, %arg7: memref<1x64xf32, #tpu.memory_space<vmem>>, %arg8: memref<64x128xbf16, #tpu.memory_space<vmem>>, %arg9: memref<1x128xf32, #tpu.memory_space<vmem>>, %arg10: memref<8x128xbf16, #tpu.memory_space<vmem>>) attributes {dimension_semantics = [#tpu.dimension_semantics<parallel>], iteration_bounds = array<i64: 1>, scalar_prefetch = 0 : i64, scratch_operands = 0 : i64, tpu.core_type = #tpu.core_type<tc>, window_params = [{transform_indices = @transform_0, window_bounds = array<i64: 8, 32>}, {pipeline_mode = #tpu.pipeline_mode<synchronous>, transform_indices = @transform_1, window_bounds = array<i64: 32, 64>}, {pipeline_mode = #tpu.pipeline_mode<synchronous>, transform_indices = @transform_2, window_bounds = array<i64: 1, 64>}, {pipeline_mode = #tpu.pipeline_mode<synchronous>, transform_indices = @transform_3, window_bounds = array<i64: 64, 64>}, {pipeline_mode = #tpu.pipeline_mode<synchronous>, transform_indices = @transform_4, window_bounds = array<i64: 1, 64>}, {pipeline_mode = #tpu.pipeline_mode<synchronous>, transform_indices = @transform_5, window_bounds = array<i64: 64, 64>}, {pipeline_mode = #tpu.pipeline_mode<synchronous>, transform_indices = @transform_6, window_bounds = array<i64: 1, 64>}, {pipeline_mode = #tpu.pipeline_mode<synchronous>, transform_indices = @transform_7, window_bounds = array<i64: 64, 128>}, {pipeline_mode = #tpu.pipeline_mode<synchronous>, transform_indices = @transform_8, window_bounds = array<i64: 1, 128>}, {transform_indices = @transform_9, window_bounds = array<i64: 8, 128>}]} {
    %c0 = arith.constant 0 : index
    %c0_0 = arith.constant 0 : index
    %0 = vector.load %arg1[%c0, %c0_0] : memref<8x32xf32, #tpu.memory_space<vmem>>, vector<8x32xf32>
    %1 = arith.truncf %0 : vector<8x32xf32> to vector<8x32xbf16>
    %c0_1 = arith.constant 0 : index
    %c0_2 = arith.constant 0 : index
    %2 = vector.load %arg2[%c0_1, %c0_2] : memref<32x64xbf16, #tpu.memory_space<vmem>>, vector<32x64xbf16>
    %cst = arith.constant dense<0.000000e+00> : vector<8x64xf32>
    %3 = tpu.matmul %1, %2, %cst {dimension_numbers = #tpu.dot_dimension_numbers<[1], [0], [0], [1], [0, 0, 1, 1], [], []>} : vector<8x32xbf16>, vector<32x64xbf16>, vector<8x64xf32> -> vector<8x64xf32>
    %c0_3 = arith.constant 0 : index
    %c0_4 = arith.constant 0 : index
    %4 = vector.load %arg3[%c0_3, %c0_4] : memref<1x64xf32, #tpu.memory_space<vmem>>, vector<1x64xf32>
    %5 = vector.broadcast %4 : vector<1x64xf32> to vector<8x64xf32>
    %6 = arith.addf %3, %5 : vector<8x64xf32>
    %cst_5 = arith.constant 0.000000e+00 : f32
    %7 = vector.broadcast %cst_5 : f32 to vector<8x64xf32>
    %8 = arith.maximumf %6, %7 : vector<8x64xf32>
    %9 = arith.truncf %8 : vector<8x64xf32> to vector<8x64xbf16>
    %c0_6 = arith.constant 0 : index
    %c0_7 = arith.constant 0 : index
    %10 = vector.load %arg4[%c0_6, %c0_7] : memref<64x64xbf16, #tpu.memory_space<vmem>>, vector<64x64xbf16>
    %cst_8 = arith.constant dense<0.000000e+00> : vector<8x64xf32>
    %11 = tpu.matmul %9, %10, %cst_8 {dimension_numbers = #tpu.dot_dimension_numbers<[1], [0], [0], [1], [0, 0, 1, 1], [], []>} : vector<8x64xbf16>, vector<64x64xbf16>, vector<8x64xf32> -> vector<8x64xf32>
    %c0_9 = arith.constant 0 : index
    %c0_10 = arith.constant 0 : index
    %12 = vector.load %arg5[%c0_9, %c0_10] : memref<1x64xf32, #tpu.memory_space<vmem>>, vector<1x64xf32>
    %13 = vector.broadcast %12 : vector<1x64xf32> to vector<8x64xf32>
    %14 = arith.addf %11, %13 : vector<8x64xf32>
    %cst_11 = arith.constant 0.000000e+00 : f32
    %15 = vector.broadcast %cst_11 : f32 to vector<8x64xf32>
    %16 = arith.maximumf %14, %15 : vector<8x64xf32>
    %17 = arith.truncf %16 : vector<8x64xf32> to vector<8x64xbf16>
    %c0_12 = arith.constant 0 : index
    %c0_13 = arith.constant 0 : index
    %18 = vector.load %arg6[%c0_12, %c0_13] : memref<64x64xbf16, #tpu.memory_space<vmem>>, vector<64x64xbf16>
    %cst_14 = arith.constant dense<0.000000e+00> : vector<8x64xf32>
    %19 = tpu.matmul %17, %18, %cst_14 {dimension_numbers = #tpu.dot_dimension_numbers<[1], [0], [0], [1], [0, 0, 1, 1], [], []>} : vector<8x64xbf16>, vector<64x64xbf16>, vector<8x64xf32> -> vector<8x64xf32>
    %c0_15 = arith.constant 0 : index
    %c0_16 = arith.constant 0 : index
    %20 = vector.load %arg7[%c0_15, %c0_16] : memref<1x64xf32, #tpu.memory_space<vmem>>, vector<1x64xf32>
    %21 = vector.broadcast %20 : vector<1x64xf32> to vector<8x64xf32>
    %22 = arith.addf %19, %21 : vector<8x64xf32>
    %cst_17 = arith.constant 0.000000e+00 : f32
    %23 = vector.broadcast %cst_17 : f32 to vector<8x64xf32>
    %24 = arith.maximumf %22, %23 : vector<8x64xf32>
    %25 = arith.truncf %24 : vector<8x64xf32> to vector<8x64xbf16>
    %c0_18 = arith.constant 0 : index
    %c0_19 = arith.constant 0 : index
    %26 = vector.load %arg8[%c0_18, %c0_19] : memref<64x128xbf16, #tpu.memory_space<vmem>>, vector<64x128xbf16>
    %cst_20 = arith.constant dense<0.000000e+00> : vector<8x128xf32>
    %27 = tpu.matmul %25, %26, %cst_20 {dimension_numbers = #tpu.dot_dimension_numbers<[1], [0], [0], [1], [0, 0, 1, 1], [], []>} : vector<8x64xbf16>, vector<64x128xbf16>, vector<8x128xf32> -> vector<8x128xf32>
    %c0_21 = arith.constant 0 : index
    %c0_22 = arith.constant 0 : index
    %28 = vector.load %arg9[%c0_21, %c0_22] : memref<1x128xf32, #tpu.memory_space<vmem>>, vector<1x128xf32>
    %29 = vector.broadcast %28 : vector<1x128xf32> to vector<8x128xf32>
    %30 = arith.addf %27, %29 : vector<8x128xf32>
    %31 = arith.truncf %30 : vector<8x128xf32> to vector<8x128xbf16>
    %c0_23 = arith.constant 0 : index
    %c0_24 = arith.constant 0 : index
    %32 = vector.load %arg10[%c0_23, %c0_24] : memref<8x128xbf16, #tpu.memory_space<vmem>>, vector<8x128xbf16>
    tpu.vector_store %arg10[%c0_23, %c0_24], %31 {strides = array<i32>} : memref<8x128xbf16, #tpu.memory_space<vmem>>, vector<8x128xbf16>,
    return
  }
  func.func @transform_0(%arg0: i32) -> (i32, i32) {
    %c0_i32 = arith.constant 0 : i32
    %c0_i32_0 = arith.constant 0 : i32
    return %arg0, %c0_i32 : i32, i32
  }
  func.func @transform_1(%arg0: i32) -> (i32, i32) {
    %c0_i32 = arith.constant 0 : i32
    %c0_i32_0 = arith.constant 0 : i32
    %c0_i32_1 = arith.constant 0 : i32
    return %c0_i32, %c0_i32_0 : i32, i32
  }
  func.func @transform_2(%arg0: i32) -> (i32, i32) {
    %c0_i32 = arith.constant 0 : i32
    %c0_i32_0 = arith.constant 0 : i32
    %c0_i32_1 = arith.constant 0 : i32
    return %c0_i32, %c0_i32_0 : i32, i32
  }
  func.func @transform_3(%arg0: i32) -> (i32, i32) {
    %c0_i32 = arith.constant 0 : i32
    %c0_i32_0 = arith.constant 0 : i32
    %c0_i32_1 = arith.constant 0 : i32
    return %c0_i32, %c0_i32_0 : i32, i32
  }
  func.func @transform_4(%arg0: i32) -> (i32, i32) {
    %c0_i32 = arith.constant 0 : i32
    %c0_i32_0 = arith.constant 0 : i32
    %c0_i32_1 = arith.constant 0 : i32
    return %c0_i32, %c0_i32_0 : i32, i32
  }
  func.func @transform_5(%arg0: i32) -> (i32, i32) {
    %c0_i32 = arith.constant 0 : i32
    %c0_i32_0 = arith.constant 0 : i32
    %c0_i32_1 = arith.constant 0 : i32
    return %c0_i32, %c0_i32_0 : i32, i32
  }
  func.func @transform_6(%arg0: i32) -> (i32, i32) {
    %c0_i32 = arith.constant 0 : i32
    %c0_i32_0 = arith.constant 0 : i32
    %c0_i32_1 = arith.constant 0 : i32
    return %c0_i32, %c0_i32_0 : i32, i32
  }
  func.func @transform_7(%arg0: i32) -> (i32, i32) {
    %c0_i32 = arith.constant 0 : i32
    %c0_i32_0 = arith.constant 0 : i32
    %c0_i32_1 = arith.constant 0 : i32
    return %c0_i32, %c0_i32_0 : i32, i32
  }
  func.func @transform_8(%arg0: i32) -> (i32, i32) {
    %c0_i32 = arith.constant 0 : i32
    %c0_i32_0 = arith.constant 0 : i32
    %c0_i32_1 = arith.constant 0 : i32
    return %c0_i32, %c0_i32_0 : i32, i32
  }
  func.func @transform_9(%arg0: i32) -> (i32, i32) {
    %c0_i32 = arith.constant 0 : i32
    %c0_i32_0 = arith.constant 0 : i32
    return %arg0, %c0_i32 : i32, i32
  }
}

</mosaic_0001>

<bundles_post_ra>
// kernel: mlp_forward.1
= control target key start
LH: loop header
LB: loop body
LE: loop exit
PB: predicated region body
PF: predicated region fallthrough
CT: control target
= control target key end

     0   :  { %14 = vsyncpa [#allocation3], 0  ;;  %s916_s0 = inlined_call_operand.hbm [shape: f32[8,32], index: 0, kind: input, shape index: {}]   ;;  %s917_s1 = inlined_call_operand.vmem [shape: bf16[32,64], index: 1, kind: input, shape index: {}]   ;;  %s918_s2 = inlined_call_operand.vmem [shape: f32[1,64], index: 2, kind: input, shape index: {}]   ;;  %s919_s3 = inlined_call_operand.hbm [shape: bf16[64,64], index: 3, kind: input, shape index: {}]   ;;  %s920_s4 = inlined_call_operand.vmem [shape: f32[1,64], index: 4, kind: input, shape index: {}]   ;;  %s921_s5 = inlined_call_operand.hbm [shape: bf16[64,64], index: 5, kind: input, shape index: {}]   ;;  %s922_s6 = inlined_call_operand.hbm [shape: f32[1,64], index: 6, kind: input, shape index: {}]   ;;  %s923_s7 = inlined_call_operand.hbm [shape: bf16[64,128], index: 7, kind: input, shape index: {}]   ;;  %s924_s8 = inlined_call_operand.hbm [shape: f32[1,128], index: 8, kind: input, shape index: {}]   ;;  %s925_s9 = inlined_call_operand.hbm [shape: bf16[8,128], index: 9, kind: output, shape index: {}]  }
   0x1   :  { %15 = vsyncpa [#allocation6], 0 }
   0x2   :  { %16 = vsyncpa [#allocation9], 0 }
   0x3   :  { %17 = vsyncpa [#allocation12], 0 }
   0x4   :  { %18 = vsyncpa [#allocation4], 0  ;;  %s725_s30 = smov [#allocation5]   ;;  %s561_s13 = scalar_lea.hbm %s919_s3, 512 }
   0x5   :  { %s38_s10 = sshll.u32 %s725_s30, 4  ;;  %p562_p0 = scmp.ne.s32.totalorder %s919_s3, %s561_s13  ;;  %s39_s10 = int_to_ptr.vmem [resolvable:$true] %s38_s10 }
   0x6   :  { %p565_p1 = scmp.lt.u32.totalorder %s561_s13, %s919_s3 }
   0x8   :  { %p567_p2 = pnand %p565_p1, %p562_p0 }
   0xa   :  { %570 = shalt.err (!%p567_p2)
}
   0xb   :  { %s571_s18 = scalar_lea.vmem %s39_s10, 512  ;;  %p576_p4 = scmp.lt.s32.totalorder %s39_s10, %s39_s10 }
   0xc   :  { %p572_p3 = scmp.ne.s32.totalorder %s39_s10, %s571_s18  ;;  %p577_p5 = scmp.lt.s32.totalorder %s571_s18, %s571_s18 }
   0xe   :  { %p578_p6 = por %p577_p5, %p576_p4 }
  0x10   :  { %p579_p7 = pnand %p578_p6, %p572_p3 }
  0x12   :  { %582 = shalt.err (!%p579_p7)
}
  0x13   :  { %s726_s19 = smov 64   ;;  %s727_s20 = smov 4  }
  0x14   :  { %44 = dma.hbm_to_vmem [thread:$0]  %s919_s3, 512, %s39_s10, [#allocation6], %s726_s19, %s726_s19, %s727_s20  }
  0x15   :  { %s728_s23 = smov [#allocation8]   ;;  %s729_s25 = smov [#allocation2]  }
  0x16   :  { %s65_s24 = sshll.u32 %s728_s23, 4  ;;  %s25_s26 = sshll.u32 %s729_s25, 4  ;;  %s66_s24 = int_to_ptr.vmem [resolvable:$true] %s65_s24  ;;  %s26_s26 = int_to_ptr.vmem [resolvable:$true] %s25_s26 }
  0x17   :  { %s583_s29 = scalar_lea.hbm %s922_s6, 16 }
  0x18   :  { %p584_p8 = scmp.ne.s32.totalorder %s922_s6, %s583_s29  ;;  %p587_p9 = scmp.lt.u32.totalorder %s583_s29, %s922_s6 }
  0x1a   :  { %p589_p10 = pnand %p587_p9, %p584_p8 }
  0x1c   :  { %592 = shalt.err (!%p589_p10)
}
  0x1d   :  { %s593_s3 = scalar_lea.vmem %s66_s24, 16  ;;  %s597_s10 = scalar_lea.vmem %s66_s24, 32 }
  0x1e   :  { %p594_p11 = scmp.ne.s32.totalorder %s66_s24, %s593_s3  ;;  %p598_p12 = scmp.lt.s32.totalorder %s66_s24, %s66_s24 }
  0x1f   :  { %p599_p13 = scmp.lt.s32.totalorder %s597_s10, %s593_s3 }
  0x21   :  { %p600_p0 = por %p599_p13, %p598_p12 }
  0x23   :  { %p601_p1 = pnand %p600_p0, %p594_p11 }
  0x25   :  { %604 = shalt.err (!%p601_p1)
}
  0x26   :  { %68 = dma.hbm_to_vmem [thread:$0]  %s922_s6, 16, %s66_s24, [#allocation9]  }
  0x27   :  { %s605_s18 = scalar_lea.hbm %s916_s0, 128 }
  0x28   :  { %p606_p2 = scmp.ne.s32.totalorder %s916_s0, %s605_s18  ;;  %p609_p3 = scmp.lt.u32.totalorder %s605_s18, %s916_s0 }
  0x2a   :  { %p611_p4 = pnand %p609_p3, %p606_p2 }
  0x2c   :  { %614 = shalt.err (!%p611_p4)
}
  0x2d   :  { %s615_s27 = scalar_lea.vmem %s26_s26, 128  ;;  %p620_p6 = scmp.lt.s32.totalorder %s26_s26, %s26_s26 }
  0x2e   :  { %p616_p5 = scmp.ne.s32.totalorder %s26_s26, %s615_s27  ;;  %p621_p7 = scmp.lt.s32.totalorder %s615_s27, %s615_s27 }
  0x30   :  { %p622_p8 = por %p621_p7, %p620_p6 }
  0x32   :  { %p623_p9 = pnand %p622_p8, %p616_p5 }
  0x34   :  { %626 = shalt.err (!%p623_p9)
}
  0x35   :  { %28 = dma.hbm_to_vmem [thread:$0]  %s916_s0, 128, %s26_s26, [#allocation3]  }
  0x36   :  { %s730_s28 = smov [#allocation7]   ;;  %s731_s30 = smov [#allocation10]  }
  0x37   :  { %s52_s29 = sshll.u32 %s730_s28, 4  ;;  %s74_s11 = sshll.u32 %s731_s30, 4  ;;  %s53_s29 = int_to_ptr.vmem [resolvable:$true] %s52_s29  ;;  %s75_s11 = int_to_ptr.vmem [resolvable:$true] %s74_s11 }
  0x38   :  { %s627_s3 = scalar_lea.hbm %s921_s5, 512 }
  0x39   :  { %p628_p10 = scmp.ne.s32.totalorder %s921_s5, %s627_s3  ;;  %p631_p11 = scmp.lt.u32.totalorder %s627_s3, %s921_s5 }
  0x3b   :  { %p633_p12 = pnand %p631_p11, %p628_p10 }
  0x3d   :  { %636 = shalt.err (!%p633_p12)
}
  0x3e   :  { %s637_s0 = scalar_lea.vmem %s53_s29, 512  ;;  %p642_p0 = scmp.lt.s32.totalorder %s53_s29, %s53_s29 }
  0x3f   :  { %p638_p13 = scmp.ne.s32.totalorder %s53_s29, %s637_s0  ;;  %p643_p1 = scmp.lt.s32.totalorder %s637_s0, %s637_s0 }
  0x41   :  { %p644_p2 = por %p643_p1, %p642_p0 }
  0x43   :  { %p645_p3 = pnand %p644_p2, %p638_p13 }
  0x45   :  { %648 = shalt.err (!%p645_p3)
}
  0x46   :  { %58 = dma.hbm_to_vmem [thread:$0]  %s921_s5, 512, %s53_s29, [#allocation6], %s726_s19, %s726_s19, %s727_s20  }
  0x47   :  { %s649_s22 = scalar_lea.hbm %s923_s7, 512 }
  0x48   :  { %p650_p4 = scmp.ne.s32.totalorder %s923_s7, %s649_s22  ;;  %p653_p5 = scmp.lt.u32.totalorder %s649_s22, %s923_s7 }
  0x4a   :  { %p655_p6 = pnand %p653_p5, %p650_p4 }
  0x4c   :  { %658 = shalt.err (!%p655_p6)
}
  0x4d   :  { %s659_s24 = scalar_lea.vmem %s75_s11, 512  ;;  %p664_p8 = scmp.lt.s32.totalorder %s75_s11, %s75_s11 }
  0x4e   :  { %p660_p7 = scmp.ne.s32.totalorder %s75_s11, %s659_s24  ;;  %p665_p9 = scmp.lt.s32.totalorder %s659_s24, %s659_s24 }
  0x50   :  { %p666_p10 = por %p665_p9, %p664_p8 }
  0x52   :  { %p667_p11 = pnand %p666_p10, %p660_p7 }
  0x54   :  { %670 = shalt.err (!%p667_p11)
}
  0x55   :  { %80 = dma.hbm_to_vmem [thread:$0]  %s923_s7, 512, %s75_s11, [#allocation9], %s726_s19, %s726_s19, %s727_s20  }
  0x56   :  { %s732_s29 = smov [#allocation11]   ;;  %s671_s3 = scalar_lea.hbm %s924_s8, 16 }
  0x57   :  { %s87_s30 = sshll.u32 %s732_s29, 4  ;;  %p672_p12 = scmp.ne.s32.totalorder %s924_s8, %s671_s3  ;;  %s88_s30 = int_to_ptr.vmem [resolvable:$true] %s87_s30 }
  0x58   :  { %p675_p13 = scmp.lt.u32.totalorder %s671_s3, %s924_s8 }
  0x5a   :  { %p677_p0 = pnand %p675_p13, %p672_p12 }
  0x5c   :  { %680 = shalt.err (!%p677_p0)
}
  0x5d   :  { %s681_s0 = scalar_lea.vmem %s88_s30, 16  ;;  %s685_s7 = scalar_lea.vmem %s88_s30, 32 }
  0x5e   :  { %p682_p1 = scmp.ne.s32.totalorder %s88_s30, %s681_s0  ;;  %p686_p2 = scmp.lt.s32.totalorder %s88_s30, %s88_s30 }
  0x5f   :  { %p687_p3 = scmp.lt.s32.totalorder %s685_s7, %s681_s0 }
  0x61   :  { %p688_p4 = por %p687_p3, %p686_p2 }
  0x63   :  { %p689_p5 = pnand %p688_p4, %p682_p1 }
  0x65   :  { %692 = shalt.err (!%p689_p5)
}
  0x66   :  { %90 = dma.hbm_to_vmem [thread:$0]  %s924_s8, 16, %s88_s30, [#allocation12]  }
  0x67   :  { %715 = dma.done.wait [#allocation3], 128  }
  0x68   :  { %716 = vsyncadd [#allocation3], 4294967168 }
  0x69   :  { %717 = dma.done.wait [#allocation6], 1024  }
  0x6a   :  { %718 = vsyncadd [#allocation6], 4294966272 }
  0x6b   :  { %719 = dma.done.wait [#allocation9], 528  }
  0x6c   :  { %720 = vsyncadd [#allocation9], 4294966768 }
  0x6d   :  { %721 = dma.done.wait [#allocation12], 16  }
  0x6e   :  { %722 = vsyncadd [#allocation12], 4294967280  ;;  %v733_v0 = vmov 0.0   ;;  %vm734_vm0 = vmmov 0   ;;  %v547_v1 = vld [vmem:[%s917_s1] sm:$0xff]   ;;  %v548_v2 = vld [vmem:[%s917_s1 + $0x8] sm:$0xff]  }
  0x6f   :  { %492 = vmatprep.subr.bf16.mxu0 %v733_v0  ;;  %496 = vmatprep.mubr.msk.bf16.mxu0 %vm734_vm0, %v733_v0  ;;  %v110_v3 = vld [vmem:[#allocation2] sm:$0xff]  ;;  %v549_v4 = vld [vmem:[#allocation5] sm:$0xff]   ;;  %vm135_vm1 = vcmask 261120   ;;  %v550_v5 = vld [vmem:[#allocation5 + $0x8] sm:$0xff]   ;;  %vm220_vm2 = vcmask 523264  }
  0x70   :  { %500 = vmatprep.subr.bf16.mxu1 %v733_v0  ;;  %508 = vmatprep.mubr.msk.bf16.mxu1 %vm734_vm0, %v733_v0  ;;  %v111_v6 = vpack.c.bf16 %v110_v3, %v110_v3  ;;  %v551_v7 = vld [vmem:[#allocation5 + $0x10] sm:$0xff]   ;;  %v552_v8 = vld [vmem:[#allocation5 + $0x18] sm:$0xff]   ;;  %v553_v9 = vld [vmem:[#allocation7] sm:$0xff]  }
  0x71   :  { %493 = vmatpush3.bf16.msra.mxu0 %v547_v1  ;;  %501 = vmatpush3.bf16.msra.mxu1 %v549_v4  ;;  %v554_v10 = vld [vmem:[#allocation7 + $0x8] sm:$0xff]   ;;  %v555_v19 = vld [vmem:[#allocation7 + $0x10] sm:$0xff]   ;;  %v556_v20 = vld [vmem:[#allocation7 + $0x18] sm:$0xff]  }
  0x72   :  { %494 = vmatprep.subr.bf16.mxu0 %v733_v0  ;;  %502 = vmatprep.subr.bf16.mxu1 %v733_v0  ;;  %v452_v11 = vld [vmem:[%s918_s2] ss:$0 sm:$0xff]  ;;  %v558_v22 = vld [vmem:[#allocation10 + $0x8] sm:$0xff]   ;;  %v559_v31 = vld [vmem:[#allocation10 + $0x10] sm:$0xff]  }
  0x73   :  { %v557_v21 = vld [vmem:[#allocation10] sm:$0xff]   ;;  %v560_v32 = vld [vmem:[#allocation10 + $0x18] sm:$0xff]  }
  0x74   :  { %v456_v23 = vld [vmem:[%s920_s4] ss:$0 sm:$0xff]  ;;  %v462_v33 = vld [vmem:[#allocation8] ss:$0 sm:$0xff]  ;;  %v468_v41 = vld [vmem:[#allocation11] ss:$0 sm:$0xff] }
  0x75   :  { %495 = vmatpush3.bf16.msra.mxu0 %v548_v2  ;;  %503 = vmatpush3.bf16.msra.mxu1 %v550_v5  ;;  %s735_s4 = smov [#allocation13]  }
  0x76   :  { %512 = vmatprep.subr.bf16.mxu0 %v733_v0  ;;  %504 = vmatprep.subr.bf16.mxu1 %v733_v0  ;;  %s440_s22 = sshll.u32 %s735_s4, 4  ;;  %s441_s22 = int_to_ptr.vmem [resolvable:$true] %s440_s22 }
  0x77   :  { %s693_s23 = scalar_lea.vmem %s441_s22, 64  ;;  %p698_p7 = scmp.lt.s32.totalorder %s441_s22, %s441_s22 }
  0x78   :  { %497 = vmatmul.mubr.msk.bf16.vlgmr.msra.gmra.mrb[0].mxu0 %vm135_vm1, %v111_v6  ;;  %p694_p6 = scmp.ne.s32.totalorder %s441_s22, %s693_s23  ;;  %p699_p8 = scmp.lt.s32.totalorder %s693_s23, %s693_s23 }
  0x79   :  { %520 = vmatprep.mubr.msk.bf16.mxu0 %vm734_vm0, %v733_v0  ;;  %505 = vmatpush3.bf16.msra.mxu1 %v551_v7 }
  0x7a   :  { %506 = vmatprep.subr.bf16.mxu1 %v733_v0  ;;  %513 = vmatpush3.bf16.msra.mxu0 %v553_v9  ;;  %p700_p9 = por %p699_p8, %p698_p7 }
  0x7b   :  { %514 = vmatprep.subr.bf16.mxu0 %v733_v0 }
  0x7c   :  { %p701_p10 = pnand %p700_p9, %p694_p6 }
  0x7d   :  { %507 = vmatpush3.bf16.msra.mxu1 %v552_v8 }
  0x7e   :  { %524 = vmatprep.subr.bf16.mxu1 %v733_v0  ;;  %515 = vmatpush3.bf16.msra.mxu0 %v554_v10 }
  0x7f   :  { %516 = vmatprep.subr.bf16.mxu0 %v733_v0 }
  0x82   :  { %517 = vmatpush3.bf16.msra.mxu0 %v555_v19 }
  0x83   :  { %518 = vmatprep.subr.bf16.mxu0 %v733_v0 }
  0x86   :  { %519 = vmatpush3.bf16.msra.mxu0 %v556_v20 }
 0x14b   :  { %v173_v12 = vpop.f32.mrb[0].mxu0 }
 0x14c   :  { %v174_v13 = vadd.f32 %v452_v11, %v173_v12  ;;  %v498_v14 = vpop.f32.mrb[1].mxu0 }
 0x14d   :  { %v176_v15 = vpop.f32.mrb[2].mxu0 }
 0x14e   :  { %v179_v16 = vmax.f32 %v174_v13, 0.0  ;;  %v499_v17 = vpop.f32.mrb[3].mxu0 }
 0x150   :  { %v180_v18 = vpack.c.bf16 %v179_v16, %v179_v16 }
 0x152   :  { %509 = vmatmul.mubr.msk.bf16.vlgmr.msra.gmra.mrb[0].mxu1 %vm220_vm2, %v180_v18 }
 0x153   :  { %532 = vmatprep.mubr.msk.bf16.mxu1 %vm734_vm0, %v733_v0  ;;  %525 = vmatpush3.bf16.msra.mxu1 %v557_v21 }
 0x154   :  { %526 = vmatprep.subr.bf16.mxu1 %v733_v0 }
 0x157   :  { %527 = vmatpush3.bf16.msra.mxu1 %v558_v22 }
 0x158   :  { %528 = vmatprep.subr.bf16.mxu1 %v733_v0 }
 0x15b   :  { %529 = vmatpush3.bf16.msra.mxu1 %v559_v31 }
 0x15c   :  { %530 = vmatprep.subr.bf16.mxu1 %v733_v0 }
 0x15f   :  { %531 = vmatpush3.bf16.msra.mxu1 %v560_v32 }
 0x225   :  { %v258_v24 = vpop.f32.mrb[0].mxu1 }
 0x226   :  { %v259_v25 = vadd.f32 %v456_v23, %v258_v24  ;;  %v510_v26 = vpop.f32.mrb[1].mxu1 }
 0x227   :  { %v261_v27 = vpop.f32.mrb[2].mxu1 }
 0x228   :  { %v264_v28 = vmax.f32 %v259_v25, 0.0  ;;  %v511_v29 = vpop.f32.mrb[3].mxu1 }
 0x22a   :  { %v265_v30 = vpack.c.bf16 %v264_v28, %v264_v28 }
 0x22c   :  { %521 = vmatmul.mubr.msk.bf16.vlgmr.msra.gmra.mrb[4].mxu0 %vm220_vm2, %v265_v30 }
 0x2ff   :  { %v342_v34 = vpop.f32.mrb[4].mxu0 }
 0x300   :  { %v343_v35 = vadd.f32 %v462_v33, %v342_v34  ;;  %v522_v36 = vpop.f32.mrb[5].mxu0 }
 0x301   :  { %v345_v37 = vpop.f32.mrb[6].mxu0 }
 0x302   :  { %v348_v38 = vmax.f32 %v343_v35, 0.0  ;;  %v523_v39 = vpop.f32.mrb[7].mxu0 }
 0x304   :  { %v349_v40 = vpack.c.bf16 %v348_v38, %v348_v38 }
 0x306   :  { %533 = vmatmul.mubr.msk.bf16.vlgmr.msra.gmra.mrb[4].mxu1 %vm220_vm2, %v349_v40 }
 0x3d9   :  { %v426_v42 = vpop.f32.mrb[4].mxu1 }
 0x3da   :  { %v427_v43 = vadd.f32 %v468_v41, %v426_v42  ;;  %v534_v44 = vpop.f32.mrb[5].mxu1 }
 0x3db   :  { %v429_v45 = vpop.f32.mrb[6].mxu1 }
 0x3dc   :  { %v432_v46 = vpack.c.bf16 %v427_v43, %v427_v43  ;;  %v535_v47 = vpop.f32.mrb[7].mxu1 }
 0x3de   :  { %433 = vst [vmem:[#allocation13] sm:$0xf] %v432_v46 }
 0x3df   :  { %704 = shalt.err (!%p701_p10)
}
 0x3e0   :  { %s705_s6 = scalar_lea.hbm %s925_s9, 64 }
 0x3e1   :  { %p706_p11 = scmp.ne.s32.totalorder %s925_s9, %s705_s6  ;;  %p709_p12 = scmp.lt.u32.totalorder %s705_s6, %s925_s9 }
 0x3e3   :  { %p711_p13 = pnand %p709_p12, %p706_p11 }
 0x3e5   :  { %714 = shalt.err (!%p711_p13)
}
 0x3e6   :  { %443 = dma.vmem_to_hbm [thread:$0]  %s441_s22, 64, %s925_s9, [#allocation4]  }
 0x3e7   :  { %723 = dma.done.wait [#allocation4], 64  }
 0x3e8   :  { %724 = vsyncadd [#allocation4], 4294967232 }
 0x3e9   :  { %447 = vsyncpa [#allocation3], 1 }
 0x3ea   :  { %448 = vsyncpa [#allocation6], 1 }
 0x3eb   :  { %449 = vsyncpa [#allocation9], 1 }
 0x3ec   :  { %450 = vsyncpa [#allocation12], 1 }
 0x3ed   :  { %451 = vsyncpa [#allocation4], 1 }

</bundles_post_ra>
